<compile_context>
chip_gen: v7x
topology: tpu7x:2x2x1
jax: 0.10.0
libtpu: 0.0.40
codegen_flags: <defaults>
</compile_context>

<pallas_src>
import jax
import jax.numpy as jnp
from jax import lax
from jax.experimental import pallas as pl
from jax.experimental.pallas import tpu as pltpu


def _cdiv(a, b):
    return (a + b - 1) // b


def _round_up(x, m):
    return _cdiv(x, m) * m


def cross_sim_kernel(q_ref, b_ref, o_ref):
    # q_ref: (tq, D)     bf16   streamed query-row tile
    # b_ref: (D, Nd_p)   bf16   B = W @ da^T (precomputed), lane-dense, resident
    # o_ref: (tq, Nd_p)  out    Nd_p multiple of 128 -> unmasked lane-dense stores
    cross = jnp.dot(q_ref[...], b_ref[...], preferred_element_type=jnp.float32)
    # F.normalize(p=2, dim=1): row / max(||row||_2, eps), eps = 1e-12.
    # Zero-padded B columns / q rows contribute exactly 0 -> norms are exact.
    # rsqrt is a single EUP op (free slot) instead of sqrt + divide.
    sumsq = jnp.sum(cross * cross, axis=1, keepdims=True)
    eps2 = jnp.float32(1e-24)            # eps^2 for eps = 1e-12 (normal f32)
    o_ref[...] = (cross * lax.rsqrt(jnp.maximum(sumsq, eps2))).astype(o_ref.dtype)


def _choose_tq(Nq, max_tq):
    max_tq = max(16, _round_up(max_tq, 16))
    n_tiles = _cdiv(Nq, max_tq)
    # Give the v7x megacore at least 2 grid steps whenever Nq allows two full
    # 16-row (bf16 sublane) tiles; the extra step costs ~0.35us on 1-TC parts.
    if Nq >= 32:
        n_tiles = max(n_tiles, 2)
    return _round_up(_cdiv(Nq, n_tiles), 16)   # bf16 sublane tile is 16 rows


def cross_sim_forward(batch_q_em, batch_da_em, weight, *, max_tq=256,
                      compute_dtype=jnp.bfloat16, out_dtype=jnp.float32):
    Nq, D = batch_q_em.shape
    Nd, D2 = batch_da_em.shape
    assert D == D2 == weight.shape[0] == weight.shape[1]

    tq = _choose_tq(Nq, max_tq)
    Nq_p = _round_up(Nq, tq)
    Nd_p = _round_up(Nd, 128)            # lane-dense output slab

    # ---- wrapper-side prep: one XLA matmul + minimal padding ---------------
    # Fold W into da: B = W @ da^T  (D, Nd).  bf16 MXU inputs, f32 accumulate.
    b = jnp.dot(weight.astype(compute_dtype),
                batch_da_em.astype(compute_dtype).T,
                preferred_element_type=jnp.float32).astype(compute_dtype)
    if Nd_p != Nd:
        b = jnp.zeros((D, Nd_p), compute_dtype).at[:, :Nd].set(b)

    q = batch_q_em.astype(compute_dtype)
    if Nq_p != Nq:
        q = jnp.zeros((Nq_p, D), compute_dtype).at[:Nq].set(q)

    grid = (Nq_p // tq,)

    # ---- VMEM budget, clamped to the device's real capacity ----------------
    isz = jnp.dtype(compute_dtype).itemsize
    osz = jnp.dtype(out_dtype).itemsize
    vmem_need = (
        2 * D * Nd_p * isz            # B (worst case: default double buffer)
        + 2 * tq * D * isz            # q tile, double buffered
        + 2 * tq * Nd_p * osz         # out tile, double buffered
        + tq * Nd_p * 4               # f32 `cross` intermediate
        + (2 << 20))                  # headroom
    try:
        vmem_cap = int(pltpu.get_tpu_info().vmem_capacity_bytes)
    except Exception:
        vmem_cap = 64 << 20           # conservative (v7x per-TC)
    vmem_limit = int(min(max(vmem_need, 16 << 20), vmem_cap))
    # TODO(synk): for very large Nd (B + out tiles near the VMEM cap) add an
    # inner "arbitrary" Nd grid axis with a two-pass normalize instead of
    # shrinking tq.

    cost = pl.CostEstimate(
        flops=2 * Nq_p * D * Nd_p + 3 * Nq_p * Nd_p,
        transcendentals=Nq_p,
        bytes_accessed=Nq_p * D * isz + D * Nd_p * isz + Nq_p * Nd_p * osz)

    def build(b_spec):
        return pl.pallas_call(
            cross_sim_kernel,
            out_shape=jax.ShapeDtypeStruct((Nq_p, Nd_p), out_dtype),
            grid_spec=pltpu.PrefetchScalarGridSpec(
                num_scalar_prefetch=0,
                grid=grid,
                in_specs=[
                    pl.BlockSpec((tq, D), lambda i: (i, 0)),   # streamed q tile
                    b_spec,                                    # resident B
                ],
                out_specs=pl.BlockSpec((tq, Nd_p), lambda i: (i, 0)),
            ),
            compiler_params=pltpu.CompilerParams(
                dimension_semantics=("parallel",),
                vmem_limit_bytes=vmem_limit,
            ),
            cost_estimate=cost,
        )

    try:
        # B's index_map is constant across the grid -> a single VMEM buffer is
        # enough; halves its footprint (the difference between fitting and not
        # fitting on v7x's 64 MiB at large D*Nd).
        b_single = pl.BlockSpec((D, Nd_p), lambda i: (0, 0),
                                pipeline_mode=pl.Buffered(1))
        out = build(b_single)(q, b)
    except Exception:
        out = build(pl.BlockSpec((D, Nd_p), lambda i: (0, 0)))(q, b)

    if Nq_p == Nq and Nd_p == Nd:
        return out
    return out[:Nq, :Nd]


def cross_sim_reference_f32(batch_q_em, batch_da_em, weight):
    cross = batch_q_em @ weight @ batch_da_em.T
    norm = jnp.sqrt(jnp.sum(cross * cross, axis=1, keepdims=True))
    return cross / jnp.maximum(norm, 1e-12)


def cross_sim_reference_matched(batch_q_em, batch_da_em, weight,
                                compute_dtype=jnp.bfloat16):
    # Same association / mixed precision as the kernel: B = W @ da^T first.
    b = jnp.dot(weight.astype(compute_dtype),
                batch_da_em.astype(compute_dtype).T,
                preferred_element_type=jnp.float32).astype(compute_dtype)
    cross = jnp.dot(batch_q_em.astype(compute_dtype), b,
                    preferred_element_type=jnp.float32)
    sumsq = jnp.sum(cross * cross, axis=1, keepdims=True)
    return cross * lax.rsqrt(jnp.maximum(sumsq, jnp.float32(1e-24)))


if __name__ == "__main__":
    D = 32       # embedding dim
    Nq = 16      # number of query embeddings
    Nd = 16      # number of doc/answer embeddings

    key = jax.random.PRNGKey(0)
    kq, kd, kw = jax.random.split(key, 3)
    batch_q_em = jax.random.normal(kq, (Nq, D), dtype=jnp.float32)
    batch_da_em = jax.random.normal(kd, (Nd, D), dtype=jnp.float32)
    weight = jax.random.normal(kw, (D, D), dtype=jnp.float32)  # torch.randn(D, D)

    out = cross_sim_forward(batch_q_em, batch_da_em, weight)
    out = jax.block_until_ready(out)
    assert out.shape == (Nq, Nd)

    # Tight check against a reference using the same association / precision.
    ref_m = cross_sim_reference_matched(batch_q_em, batch_da_em, weight)
    assert jnp.allclose(out, ref_m, atol=1e-4, rtol=1e-4), "mismatch vs matched ref"

    # Loose check against the full-f32 PyTorch-equivalent math (bf16 MXU inputs).
    ref_f32 = cross_sim_reference_f32(batch_q_em, batch_da_em, weight)
    assert jnp.allclose(out, ref_f32, atol=5e-2, rtol=5e-2), "mismatch vs f32 ref"

    print("KERNEL_OK")
</pallas_src>

<mosaic_0001>
module attributes {stable_mosaic.version = 11 : i64} {
  func.func @cross_sim_kernel(%arg0: i32, %arg1: memref<16x32xbf16, #tpu.memory_space<vmem>>, %arg2: memref<32x128xbf16, #tpu.memory_space<vmem>>, %arg3: memref<16x128xf32, #tpu.memory_space<vmem>>) attributes {dimension_semantics = [#tpu.dimension_semantics<parallel>], iteration_bounds = array<i64: 1>, scalar_prefetch = 0 : i64, scratch_operands = 0 : i64, tpu.core_type = #tpu.core_type<tc>, window_params = [{transform_indices = @transform_0, window_bounds = array<i64: 16, 32>}, {pipeline_mode = #tpu.pipeline_mode<synchronous>, transform_indices = @transform_1, window_bounds = array<i64: 32, 128>}, {transform_indices = @transform_2, window_bounds = array<i64: 16, 128>}]} {
    %c0 = arith.constant 0 : index
    %c0_0 = arith.constant 0 : index
    %0 = vector.load %arg1[%c0, %c0_0] : memref<16x32xbf16, #tpu.memory_space<vmem>>, vector<16x32xbf16>
    %c0_1 = arith.constant 0 : index
    %c0_2 = arith.constant 0 : index
    %1 = vector.load %arg2[%c0_1, %c0_2] : memref<32x128xbf16, #tpu.memory_space<vmem>>, vector<32x128xbf16>
    %cst = arith.constant dense<0.000000e+00> : vector<16x128xf32>
    %2 = tpu.matmul %0, %1, %cst {dimension_numbers = #tpu.dot_dimension_numbers<[1], [0], [0], [1], [0, 0, 1, 1], [], []>} : vector<16x32xbf16>, vector<32x128xbf16>, vector<16x128xf32> -> vector<16x128xf32>
    %3 = arith.mulf %2, %2 : vector<16x128xf32>
    %cst_3 = arith.constant dense<0.000000e+00> : vector<16xf32>
    %4 = vector.multi_reduction <add>, %3, %cst_3 [1] : vector<16x128xf32> to vector<16xf32>
    %5 = vector.shape_cast %4 : vector<16xf32> to vector<16x1xf32>
    %cst_4 = arith.constant 1.000000e-24 : f32
    %6 = vector.broadcast %cst_4 : f32 to vector<16x1xf32>
    %7 = arith.maximumf %5, %6 : vector<16x1xf32>
    %8 = math.rsqrt %7 : vector<16x1xf32>
    %9 = vector.broadcast %8 : vector<16x1xf32> to vector<16x128xf32>
    %10 = arith.mulf %2, %9 : vector<16x128xf32>
    %c0_5 = arith.constant 0 : index
    %c0_6 = arith.constant 0 : index
    %11 = vector.load %arg3[%c0_5, %c0_6] : memref<16x128xf32, #tpu.memory_space<vmem>>, vector<16x128xf32>
    tpu.vector_store %arg3[%c0_5, %c0_6], %10 {strides = array<i32>} : memref<16x128xf32, #tpu.memory_space<vmem>>, vector<16x128xf32>,
    return
  }
  func.func @transform_0(%arg0: i32) -> (i32, i32) {
    %c0_i32 = arith.constant 0 : i32
    %c0_i32_0 = arith.constant 0 : i32
    return %arg0, %c0_i32 : i32, i32
  }
  func.func @transform_1(%arg0: i32) -> (i32, i32) {
    %c0_i32 = arith.constant 0 : i32
    %c0_i32_0 = arith.constant 0 : i32
    %c0_i32_1 = arith.constant 0 : i32
    return %c0_i32, %c0_i32_0 : i32, i32
  }
  func.func @transform_2(%arg0: i32) -> (i32, i32) {
    %c0_i32 = arith.constant 0 : i32
    %c0_i32_0 = arith.constant 0 : i32
    return %arg0, %c0_i32 : i32, i32
  }
}

module attributes {stable_mosaic.version = 11 : i64} {
  func.func @cross_sim_kernel(%arg0: i32, %arg1: memref<16x32xbf16, #tpu.memory_space<vmem>>, %arg2: memref<32x128xbf16, #tpu.memory_space<vmem>>, %arg3: memref<16x128xf32, #tpu.memory_space<vmem>>) attributes {dimension_semantics = [#tpu.dimension_semantics<parallel>], iteration_bounds = array<i64: 1>, scalar_prefetch = 0 : i64, scratch_operands = 0 : i64, tpu.core_type = #tpu.core_type<tc>, window_params = [{transform_indices = @transform_0, window_bounds = array<i64: 16, 32>}, {pipeline_mode = #tpu.pipeline_mode<synchronous>, transform_indices = @transform_1, window_bounds = array<i64: 32, 128>}, {transform_indices = @transform_2, window_bounds = array<i64: 16, 128>}]} {
    %c0 = arith.constant 0 : index
    %c0_0 = arith.constant 0 : index
    %0 = vector.load %arg1[%c0, %c0_0] : memref<16x32xbf16, #tpu.memory_space<vmem>>, vector<16x32xbf16>
    %c0_1 = arith.constant 0 : index
    %c0_2 = arith.constant 0 : index
    %1 = vector.load %arg2[%c0_1, %c0_2] : memref<32x128xbf16, #tpu.memory_space<vmem>>, vector<32x128xbf16>
    %cst = arith.constant dense<0.000000e+00> : vector<16x128xf32>
    %2 = tpu.matmul %0, %1, %cst {dimension_numbers = #tpu.dot_dimension_numbers<[1], [0], [0], [1], [0, 0, 1, 1], [], []>} : vector<16x32xbf16>, vector<32x128xbf16>, vector<16x128xf32> -> vector<16x128xf32>
    %3 = arith.mulf %2, %2 : vector<16x128xf32>
    %cst_3 = arith.constant dense<0.000000e+00> : vector<16xf32>
    %4 = vector.multi_reduction <add>, %3, %cst_3 [1] : vector<16x128xf32> to vector<16xf32>
    %5 = vector.shape_cast %4 : vector<16xf32> to vector<16x1xf32>
    %cst_4 = arith.constant 1.000000e-24 : f32
    %6 = vector.broadcast %cst_4 : f32 to vector<16x1xf32>
    %7 = arith.maximumf %5, %6 : vector<16x1xf32>
    %8 = math.rsqrt %7 : vector<16x1xf32>
    %9 = vector.broadcast %8 : vector<16x1xf32> to vector<16x128xf32>
    %10 = arith.mulf %2, %9 : vector<16x128xf32>
    %c0_5 = arith.constant 0 : index
    %c0_6 = arith.constant 0 : index
    %11 = vector.load %arg3[%c0_5, %c0_6] : memref<16x128xf32, #tpu.memory_space<vmem>>, vector<16x128xf32>
    tpu.vector_store %arg3[%c0_5, %c0_6], %10 {strides = array<i32>} : memref<16x128xf32, #tpu.memory_space<vmem>>, vector<16x128xf32>,
    return
  }
  func.func @transform_0(%arg0: i32) -> (i32, i32) {
    %c0_i32 = arith.constant 0 : i32
    %c0_i32_0 = arith.constant 0 : i32
    return %arg0, %c0_i32 : i32, i32
  }
  func.func @transform_1(%arg0: i32) -> (i32, i32) {
    %c0_i32 = arith.constant 0 : i32
    %c0_i32_0 = arith.constant 0 : i32
    %c0_i32_1 = arith.constant 0 : i32
    return %c0_i32, %c0_i32_0 : i32, i32
  }
  func.func @transform_2(%arg0: i32) -> (i32, i32) {
    %c0_i32 = arith.constant 0 : i32
    %c0_i32_0 = arith.constant 0 : i32
    return %arg0, %c0_i32 : i32, i32
  }
}

</mosaic_0001>

<bundles_post_ra>
// kernel: tpu_custom_call.1
= control target key start
LH: loop header
LB: loop body
LE: loop exit
PB: predicated region body
PF: predicated region fallthrough
CT: control target
= control target key end

     0   :  { %7 = vsyncpa [#allocation3], 0  ;;  %s304_s0 = inlined_call_operand.hbm [shape: bf16[16,32], index: 0, kind: input, shape index: {}]   ;;  %s305_s1 = inlined_call_operand.hbm [shape: bf16[32,128], index: 1, kind: input, shape index: {}]   ;;  %s306_s2 = inlined_call_operand.hbm [shape: f32[16,128], index: 2, kind: output, shape index: {}]  }
   0x1   :  { %8 = vsyncpa [#allocation6], 0 }
   0x2   :  { %9 = vsyncpa [#allocation4], 0  ;;  %s244_s9 = smov [#allocation2]   ;;  %s172_s13 = scalar_lea.hbm %s304_s0, 128 }
   0x3   :  { %s15_s10 = sshll.u32 %s244_s9, 4  ;;  %p173_p0 = scmp.ne.s32.totalorder %s304_s0, %s172_s13  ;;  %s16_s10 = int_to_ptr.vmem [resolvable:$true] %s15_s10 }
   0x4   :  { %p176_p1 = scmp.lt.u32.totalorder %s172_s13, %s304_s0 }
   0x6   :  { %p178_p2 = pnand %p176_p1, %p173_p0 }
   0x8   :  { %181 = shalt.err (!%p178_p2)
}
   0x9   :  { %s182_s18 = scalar_lea.vmem %s16_s10, 128  ;;  %p187_p4 = scmp.lt.s32.totalorder %s16_s10, %s16_s10 }
   0xa   :  { %p183_p3 = scmp.ne.s32.totalorder %s16_s10, %s182_s18  ;;  %p188_p5 = scmp.lt.s32.totalorder %s182_s18, %s182_s18 }
   0xc   :  { %p189_p6 = por %p188_p5, %p187_p4 }
   0xe   :  { %p190_p7 = pnand %p189_p6, %p183_p3 }
  0x10   :  { %193 = shalt.err (!%p190_p7)
}
  0x11   :  { %s245_s19 = smov 64   ;;  %s246_s20 = smov 4  }
  0x12   :  { %21 = dma.hbm_to_vmem [thread:$0]  %s304_s0, 128, %s16_s10, [#allocation3], %s245_s19, %s245_s19, %s246_s20  }
  0x13   :  { %s247_s23 = smov [#allocation5]   ;;  %s194_s27 = scalar_lea.hbm %s305_s1, 256 }
  0x14   :  { %s27_s24 = sshll.u32 %s247_s23, 4  ;;  %p195_p8 = scmp.ne.s32.totalorder %s305_s1, %s194_s27  ;;  %s28_s24 = int_to_ptr.vmem [resolvable:$true] %s27_s24 }
  0x15   :  { %p198_p9 = scmp.lt.u32.totalorder %s194_s27, %s305_s1 }
  0x17   :  { %p200_p10 = pnand %p198_p9, %p195_p8 }
  0x19   :  { %203 = shalt.err (!%p200_p10)
}
  0x1a   :  { %s204_s4 = scalar_lea.vmem %s28_s24, 256  ;;  %p209_p12 = scmp.lt.s32.totalorder %s28_s24, %s28_s24 }
  0x1b   :  { %p205_p11 = scmp.ne.s32.totalorder %s28_s24, %s204_s4  ;;  %p210_p13 = scmp.lt.s32.totalorder %s204_s4, %s204_s4 }
  0x1d   :  { %p211_p0 = por %p210_p13, %p209_p12 }
  0x1f   :  { %p212_p1 = pnand %p211_p0, %p205_p11 }
  0x21   :  { %215 = shalt.err (!%p212_p1)
}
  0x22   :  { %33 = dma.hbm_to_vmem [thread:$0]  %s305_s1, 256, %s28_s24, [#allocation6], %s245_s19, %s245_s19, %s246_s20  }
  0x23   :  { %238 = dma.done.wait [#allocation3], 128  }
  0x24   :  { %239 = vsyncadd [#allocation3], 4294967168 }
  0x25   :  { %240 = dma.done.wait [#allocation6], 256  }
  0x26   :  { %241 = vsyncadd [#allocation6], 4294967040  ;;  %v248_v0 = vmov 0.0   ;;  %vm249_vm0 = vmmov 0   ;;  %v165_v1 = vld [vmem:[#allocation5] sm:$0xff]   ;;  %v166_v2 = vld [vmem:[#allocation5 + $0x8] sm:$0xff]  }
  0x27   :  { %148 = vmatprep.subr.bf16.mxu0 %v248_v0  ;;  %152 = vmatprep.mubr.msk.bf16.mxu0 %vm249_vm0, %v248_v0  ;;  %v167_v3 = vld [vmem:[#allocation2] sm:$0xff]   ;;  %vm64_vm1 = vcmask 261120   ;;  %s250_s1 = smov [#allocation7]  }
  0x28   :  { %149 = vmatpush3.bf16.msra.mxu0 %v165_v1  ;;  %s128_s6 = sshll.u32 %s250_s1, 4  ;;  %s129_s6 = int_to_ptr.vmem [resolvable:$true] %s128_s6 }
  0x29   :  { %150 = vmatprep.subr.bf16.mxu0 %v248_v0  ;;  %s216_s7 = scalar_lea.vmem %s129_s6, 256  ;;  %p221_p3 = scmp.lt.s32.totalorder %s129_s6, %s129_s6 }
  0x2a   :  { %p217_p2 = scmp.ne.s32.totalorder %s129_s6, %s216_s7  ;;  %p222_p4 = scmp.lt.s32.totalorder %s216_s7, %s216_s7 }
  0x2c   :  { %151 = vmatpush3.bf16.msra.mxu0 %v166_v2  ;;  %p223_p5 = por %p222_p4, %p221_p3 }
  0x2e   :  { %p224_p6 = pnand %p223_p5, %p217_p2 }
  0x2f   :  { %153 = vmatmul.mubr.msk.bf16.vlgmr.msra.gmra.mrb[0].mxu0 %vm64_vm1, %v167_v3 }
 0x102   :  { %v102_v4 = vpop.f32.mrb[0].mxu0 }
 0x103   :  { %v154_v5 = vpop.f32.mrb[1].mxu0  ;;  %v109_v6 = vmul.f32 %v102_v4, %v102_v4 }
 0x104   :  { %v105_v7 = vpop.f32.mrb[2].mxu0 }
 0x105   :  { %111 = vadd.xlane.f32.xlu0 %v109_v6  ;;  %v155_v8 = vpop.f32.mrb[3].mxu0  ;;  %v110_v9 = vmul.f32 %v105_v7, %v105_v7 }
 0x109   :  { %113 = vadd.xlane.f32.xlu0 %v110_v9 }
 0x192   :  { %v112_v10 = vpop.xlane.xlu0 %111 }
 0x193   :  { %v115_v11 = vmax.f32 %v112_v10, 1e-24 }
 0x195   :  { %168 = vrsqrt.f32 %v115_v11 }
 0x196   :  { %v114_v12 = vpop.xlane.xlu0 %113 }
 0x197   :  { %v116_v13 = vmax.f32 %v114_v12, 1e-24 }
 0x199   :  { %170 = vrsqrt.f32 %v116_v13 }
 0x19f   :  { %v169_v14 = vpop.eup %168 }
 0x1a0   :  { %v119_v15 = vmul.f32 %v169_v14, %v102_v4 }
 0x1a2   :  { %121 = vst [vmem:[#allocation7] sm:$0xff] %v119_v15 }
 0x1a3   :  { %v171_v16 = vpop.eup %170 }
 0x1a4   :  { %v120_v17 = vmul.f32 %v171_v16, %v105_v7 }
 0x1a6   :  { %122 = vst [vmem:[#allocation7 + $0x8] sm:$0xff] %v120_v17 }
 0x1a7   :  { %227 = shalt.err (!%p224_p6)
}
 0x1a8   :  { %s228_s10 = scalar_lea.hbm %s306_s2, 256 }
 0x1a9   :  { %p229_p7 = scmp.ne.s32.totalorder %s306_s2, %s228_s10  ;;  %p232_p8 = scmp.lt.u32.totalorder %s228_s10, %s306_s2 }
 0x1ab   :  { %p234_p9 = pnand %p232_p8, %p229_p7 }
 0x1ad   :  { %237 = shalt.err (!%p234_p9)
}
 0x1ae   :  { %s251_s15 = smov 128   ;;  %s252_s16 = smov 8  }
 0x1af   :  { %134 = dma.vmem_to_hbm [thread:$0]  %s129_s6, 256, %s306_s2, [#allocation4], %s251_s15, %s251_s15, %s252_s16  }
 0x1b0   :  { %242 = dma.done.wait [#allocation4], 256  }
 0x1b1   :  { %243 = vsyncadd [#allocation4], 4294967040 }
 0x1b2   :  { %138 = vsyncpa [#allocation3], 1 }
 0x1b3   :  { %139 = vsyncpa [#allocation6], 1 }
 0x1b4   :  { %140 = vsyncpa [#allocation4], 1 }

// kernel: tpu_custom_call.1
= control target key start
LH: loop header
LB: loop body
LE: loop exit
PB: predicated region body
PF: predicated region fallthrough
CT: control target
= control target key end

     0   :  { %7 = vsyncpa [#allocation3], 0  ;;  %s304_s0 = inlined_call_operand.hbm [shape: bf16[16,32], index: 0, kind: input, shape index: {}]   ;;  %s305_s1 = inlined_call_operand.hbm [shape: bf16[32,128], index: 1, kind: input, shape index: {}]   ;;  %s306_s2 = inlined_call_operand.hbm [shape: f32[16,128], index: 2, kind: output, shape index: {}]  }
   0x1   :  { %8 = vsyncpa [#allocation6], 0 }
   0x2   :  { %9 = vsyncpa [#allocation4], 0  ;;  %s244_s9 = smov [#allocation2]   ;;  %s172_s13 = scalar_lea.hbm %s304_s0, 128 }
   0x3   :  { %s15_s10 = sshll.u32 %s244_s9, 4  ;;  %p173_p0 = scmp.ne.s32.totalorder %s304_s0, %s172_s13  ;;  %s16_s10 = int_to_ptr.vmem [resolvable:$true] %s15_s10 }
   0x4   :  { %p176_p1 = scmp.lt.u32.totalorder %s172_s13, %s304_s0 }
   0x6   :  { %p178_p2 = pnand %p176_p1, %p173_p0 }
   0x8   :  { %181 = shalt.err (!%p178_p2)
}
   0x9   :  { %s182_s18 = scalar_lea.vmem %s16_s10, 128  ;;  %p187_p4 = scmp.lt.s32.totalorder %s16_s10, %s16_s10 }
   0xa   :  { %p183_p3 = scmp.ne.s32.totalorder %s16_s10, %s182_s18  ;;  %p188_p5 = scmp.lt.s32.totalorder %s182_s18, %s182_s18 }
   0xc   :  { %p189_p6 = por %p188_p5, %p187_p4 }
   0xe   :  { %p190_p7 = pnand %p189_p6, %p183_p3 }
  0x10   :  { %193 = shalt.err (!%p190_p7)
}
  0x11   :  { %s245_s19 = smov 64   ;;  %s246_s20 = smov 4  }
  0x12   :  { %21 = dma.hbm_to_vmem [thread:$0]  %s304_s0, 128, %s16_s10, [#allocation3], %s245_s19, %s245_s19, %s246_s20  }
  0x13   :  { %s247_s23 = smov [#allocation5]   ;;  %s194_s27 = scalar_lea.hbm %s305_s1, 256 }
  0x14   :  { %s27_s24 = sshll.u32 %s247_s23, 4  ;;  %p195_p8 = scmp.ne.s32.totalorder %s305_s1, %s194_s27  ;;  %s28_s24 = int_to_ptr.vmem [resolvable:$true] %s27_s24 }
  0x15   :  { %p198_p9 = scmp.lt.u32.totalorder %s194_s27, %s305_s1 }
  0x17   :  { %p200_p10 = pnand %p198_p9, %p195_p8 }
  0x19   :  { %203 = shalt.err (!%p200_p10)
}
  0x1a   :  { %s204_s4 = scalar_lea.vmem %s28_s24, 256  ;;  %p209_p12 = scmp.lt.s32.totalorder %s28_s24, %s28_s24 }
  0x1b   :  { %p205_p11 = scmp.ne.s32.totalorder %s28_s24, %s204_s4  ;;  %p210_p13 = scmp.lt.s32.totalorder %s204_s4, %s204_s4 }
  0x1d   :  { %p211_p0 = por %p210_p13, %p209_p12 }
  0x1f   :  { %p212_p1 = pnand %p211_p0, %p205_p11 }
  0x21   :  { %215 = shalt.err (!%p212_p1)
}
  0x22   :  { %33 = dma.hbm_to_vmem [thread:$0]  %s305_s1, 256, %s28_s24, [#allocation6], %s245_s19, %s245_s19, %s246_s20  }
  0x23   :  { %238 = dma.done.wait [#allocation3], 128  }
  0x24   :  { %239 = vsyncadd [#allocation3], 4294967168 }
  0x25   :  { %240 = dma.done.wait [#allocation6], 256  }
  0x26   :  { %241 = vsyncadd [#allocation6], 4294967040  ;;  %v248_v0 = vmov 0.0   ;;  %vm249_vm0 = vmmov 0   ;;  %v165_v1 = vld [vmem:[#allocation5] sm:$0xff]   ;;  %v166_v2 = vld [vmem:[#allocation5 + $0x8] sm:$0xff]  }
  0x27   :  { %148 = vmatprep.subr.bf16.mxu0 %v248_v0  ;;  %152 = vmatprep.mubr.msk.bf16.mxu0 %vm249_vm0, %v248_v0  ;;  %v167_v3 = vld [vmem:[#allocation2] sm:$0xff]   ;;  %vm64_vm1 = vcmask 261120   ;;  %s250_s1 = smov [#allocation7]  }
  0x28   :  { %149 = vmatpush3.bf16.msra.mxu0 %v165_v1  ;;  %s128_s6 = sshll.u32 %s250_s1, 4  ;;  %s129_s6 = int_to_ptr.vmem [resolvable:$true] %s128_s6 }
  0x29   :  { %150 = vmatprep.subr.bf16.mxu0 %v248_v0  ;;  %s216_s7 = scalar_lea.vmem %s129_s6, 256  ;;  %p221_p3 = scmp.lt.s32.totalorder %s129_s6, %s129_s6 }
  0x2a   :  { %p217_p2 = scmp.ne.s32.totalorder %s129_s6, %s216_s7  ;;  %p222_p4 = scmp.lt.s32.totalorder %s216_s7, %s216_s7 }
  0x2c   :  { %151 = vmatpush3.bf16.msra.mxu0 %v166_v2  ;;  %p223_p5 = por %p222_p4, %p221_p3 }
  0x2e   :  { %p224_p6 = pnand %p223_p5, %p217_p2 }
  0x2f   :  { %153 = vmatmul.mubr.msk.bf16.vlgmr.msra.gmra.mrb[0].mxu0 %vm64_vm1, %v167_v3 }
 0x102   :  { %v102_v4 = vpop.f32.mrb[0].mxu0 }
 0x103   :  { %v154_v5 = vpop.f32.mrb[1].mxu0  ;;  %v109_v6 = vmul.f32 %v102_v4, %v102_v4 }
 0x104   :  { %v105_v7 = vpop.f32.mrb[2].mxu0 }
 0x105   :  { %111 = vadd.xlane.f32.xlu0 %v109_v6  ;;  %v155_v8 = vpop.f32.mrb[3].mxu0  ;;  %v110_v9 = vmul.f32 %v105_v7, %v105_v7 }
 0x109   :  { %113 = vadd.xlane.f32.xlu0 %v110_v9 }
 0x192   :  { %v112_v10 = vpop.xlane.xlu0 %111 }
 0x193   :  { %v115_v11 = vmax.f32 %v112_v10, 1e-24 }
 0x195   :  { %168 = vrsqrt.f32 %v115_v11 }
 0x196   :  { %v114_v12 = vpop.xlane.xlu0 %113 }
 0x197   :  { %v116_v13 = vmax.f32 %v114_v12, 1e-24 }
 0x199   :  { %170 = vrsqrt.f32 %v116_v13 }
 0x19f   :  { %v169_v14 = vpop.eup %168 }
 0x1a0   :  { %v119_v15 = vmul.f32 %v169_v14, %v102_v4 }
 0x1a2   :  { %121 = vst [vmem:[#allocation7] sm:$0xff] %v119_v15 }
 0x1a3   :  { %v171_v16 = vpop.eup %170 }
 0x1a4   :  { %v120_v17 = vmul.f32 %v171_v16, %v105_v7 }
 0x1a6   :  { %122 = vst [vmem:[#allocation7 + $0x8] sm:$0xff] %v120_v17 }
 0x1a7   :  { %227 = shalt.err (!%p224_p6)
}
 0x1a8   :  { %s228_s10 = scalar_lea.hbm %s306_s2, 256 }
 0x1a9   :  { %p229_p7 = scmp.ne.s32.totalorder %s306_s2, %s228_s10  ;;  %p232_p8 = scmp.lt.u32.totalorder %s228_s10, %s306_s2 }
 0x1ab   :  { %p234_p9 = pnand %p232_p8, %p229_p7 }
 0x1ad   :  { %237 = shalt.err (!%p234_p9)
}
 0x1ae   :  { %s251_s15 = smov 128   ;;  %s252_s16 = smov 8  }
 0x1af   :  { %134 = dma.vmem_to_hbm [thread:$0]  %s129_s6, 256, %s306_s2, [#allocation4], %s251_s15, %s251_s15, %s252_s16  }
 0x1b0   :  { %242 = dma.done.wait [#allocation4], 256  }
 0x1b1   :  { %243 = vsyncadd [#allocation4], 4294967040 }
 0x1b2   :  { %138 = vsyncpa [#allocation3], 1 }
 0x1b3   :  { %139 = vsyncpa [#allocation6], 1 }
 0x1b4   :  { %140 = vsyncpa [#allocation4], 1 }

</bundles_post_ra>
